<compile_context>
chip_gen: v6e
topology: v6e:2x2x1
jax: 0.10.0
libtpu: 0.0.40
codegen_flags: <defaults>
</compile_context>

<pallas_src>
import functools

import jax
import jax.numpy as jnp
from jax.experimental import pallas as pl
from jax.experimental.pallas import tpu as pltpu

_EPS = 1e-12  # torch.nn.functional.normalize default eps
_EPS_SQ = _EPS * _EPS  # max(sqrt(s), eps) == sqrt(max(s, eps^2))


def _l2norm_rows_kernel(x_ref, o_ref):
    """Row-wise L2 normalization of one (TR, D) tile."""
    x = x_ref[...].astype(jnp.float32)
    sumsq = jnp.sum(x * x, axis=-1, keepdims=True)
    inv = jax.lax.rsqrt(jnp.maximum(sumsq, jnp.float32(_EPS_SQ)))
    o_ref[...] = (x * inv).astype(o_ref.dtype)


def _cosine_matmul_kernel(img_ref, con_ref, out_ref, imgn_ref, *, inv_temp):
    """out[i, j] tile = normalize(img)[i] @ normalize(concept)[j].T (* 1/temp).

    img_ref:  (TM, D)   raw image tile
    con_ref:  (TN, D)   pre-normalized concept tile
    imgn_ref: (TM, D)   f32 scratch holding the normalized (and temp-scaled)
                        image tile; recomputed only when the bs tile changes
                        (class axis is the innermost grid axis).
    """
    @pl.when(pl.program_id(1) == 0)
    def _():
        x = img_ref[...].astype(jnp.float32)
        sumsq = jnp.sum(x * x, axis=-1, keepdims=True)
        inv = jax.lax.rsqrt(jnp.maximum(sumsq, jnp.float32(_EPS_SQ)))
        if inv_temp is not None:
            # Fold temperature into the per-row inverse norm: avoids a full
            # (TM, TN) output-scaling pass after the matmul.
            inv = inv * jnp.float32(inv_temp)
        imgn_ref[...] = x * inv

    # Contract the last dim of both operands directly (transposed-RHS matmul),
    # MXU with f32 accumulation -- no .T / explicit transpose of the concept
    # tile is materialized.
    pred = jax.lax.dot_general(
        imgn_ref[...],
        con_ref[...],
        dimension_numbers=(((1,), (1,)), ((), ())),
        preferred_element_type=jnp.float32,
    )
    out_ref[...] = pred.astype(out_ref.dtype)


def _round_up(x, m):
    return (x + m - 1) // m * m


def cosine_classifier(img, concept, *, temp=0.05, scale=True):
    """img: (bs, emb_dim); concept: (n_class, emb_dim) -> (bs, n_class) f32."""
    bs, emb_dim = img.shape
    n_class, emb_dim_c = concept.shape
    assert emb_dim == emb_dim_c, "embedding dims must match"

    # ---- tile sizes (re-derive per problem; all VMEM-safe on v5e/v6e/v7x) ----
    # bs (sublane axis of img / output): multiple of 8, capped at 256 rows.
    tm = 256 if bs >= 256 else _round_up(bs, 8)
    bs_pad = _round_up(bs, tm)
    # n_class (lane axis of output): pad to a multiple of 128 so output stores
    # are lane-dense; prefer 256-wide tiles (v6e/v7x MXU N), else 128.
    c_pad = _round_up(n_class, 128)
    tn = 256 if c_pad % 256 == 0 else 128

    img_p = img if bs_pad == bs else jnp.pad(img, ((0, bs_pad - bs), (0, 0)))
    con_p = (
        concept
        if c_pad == n_class
        else jnp.pad(concept, ((0, c_pad - n_class), (0, 0)))
    )

    # ---- pass 1: normalize concept rows exactly once -------------------------
    tr = 256 if c_pad % 256 == 0 else 128
    con_norm = pl.pallas_call(
        _l2norm_rows_kernel,
        out_shape=jax.ShapeDtypeStruct((c_pad, emb_dim), jnp.float32),
        grid=(c_pad // tr,),
        in_specs=[pl.BlockSpec((tr, emb_dim), lambda i: (i, 0))],
        out_specs=pl.BlockSpec((tr, emb_dim), lambda i: (i, 0)),
        compiler_params=pltpu.CompilerParams(dimension_semantics=("parallel",)),
    )(con_p.astype(jnp.float32))

    # ---- pass 2: fused img-normalize + matmul + temperature scale ------------
    inv_temp = (1.0 / float(temp)) if scale else None
    kernel = functools.partial(_cosine_matmul_kernel, inv_temp=inv_temp)

    out_p = pl.pallas_call(
        kernel,
        out_shape=jax.ShapeDtypeStruct((bs_pad, c_pad), jnp.float32),
        grid=(bs_pad // tm, c_pad // tn),
        in_specs=[
            pl.BlockSpec((tm, emb_dim), lambda i, j: (i, 0)),
            pl.BlockSpec((tn, emb_dim), lambda i, j: (j, 0)),
        ],
        out_specs=pl.BlockSpec((tm, tn), lambda i, j: (i, j)),
        scratch_shapes=[pltpu.VMEM((tm, emb_dim), jnp.float32)],
        compiler_params=pltpu.CompilerParams(
            dimension_semantics=("parallel", "arbitrary")
        ),
    )(img_p, con_norm)

    return out_p[:bs, :n_class]


def _reference(img, concept, temp=0.05, scale=True):
    def normalize(x):
        n = jnp.maximum(jnp.linalg.norm(x, axis=-1, keepdims=True), _EPS)
        return x / n

    pred = normalize(img) @ normalize(concept).T
    if scale:
        pred = pred / temp
    return pred


if __name__ == "__main__":
    key = jax.random.PRNGKey(0)
    k_img, k_con = jax.random.split(key)

    bs, emb_dim, n_class = 2, 32, 8
    img = jax.random.normal(k_img, (bs, emb_dim), dtype=jnp.float32)
    concept = jax.random.normal(k_con, (n_class, emb_dim), dtype=jnp.float32)

    # scale=True path
    out = jax.block_until_ready(cosine_classifier(img, concept, temp=0.05, scale=True))
    ref = _reference(img, concept, temp=0.05, scale=True)
    assert out.shape == (bs, n_class)
    assert jnp.allclose(out, ref, atol=2e-3, rtol=2e-3), "mismatch vs reference (scale=True)"

    # scale=False path (temperature folding disabled)
    out_ns = jax.block_until_ready(cosine_classifier(img, concept, temp=0.05, scale=False))
    ref_ns = _reference(img, concept, temp=0.05, scale=False)
    assert jnp.allclose(out_ns, ref_ns, atol=2e-3, rtol=2e-3), "mismatch vs reference (scale=False)"

    print("KERNEL_OK")
</pallas_src>

<mosaic_0001>
module attributes {stable_mosaic.version = 11 : i64} {
  func.func @_l2norm_rows_kernel(%arg0: i32, %arg1: memref<128x32xf32, #tpu.memory_space<vmem>>, %arg2: memref<128x32xf32, #tpu.memory_space<vmem>>) attributes {dimension_semantics = [#tpu.dimension_semantics<parallel>], iteration_bounds = array<i64: 1>, scalar_prefetch = 0 : i64, scratch_operands = 0 : i64, tpu.core_type = #tpu.core_type<tc>, window_params = [{transform_indices = @transform_0, window_bounds = array<i64: 128, 32>}, {transform_indices = @transform_1, window_bounds = array<i64: 128, 32>}]} {
    %c0 = arith.constant 0 : index
    %c0_0 = arith.constant 0 : index
    %0 = vector.load %arg1[%c0, %c0_0] : memref<128x32xf32, #tpu.memory_space<vmem>>, vector<128x32xf32>
    %1 = arith.mulf %0, %0 : vector<128x32xf32>
    %cst = arith.constant dense<0.000000e+00> : vector<128xf32>
    %2 = vector.multi_reduction <add>, %1, %cst [1] : vector<128x32xf32> to vector<128xf32>
    %3 = vector.shape_cast %2 : vector<128xf32> to vector<128x1xf32>
    %cst_1 = arith.constant 1.000000e-24 : f32
    %4 = vector.broadcast %cst_1 : f32 to vector<128x1xf32>
    %5 = arith.maximumf %3, %4 : vector<128x1xf32>
    %6 = math.rsqrt %5 : vector<128x1xf32>
    %7 = vector.broadcast %6 : vector<128x1xf32> to vector<128x32xf32>
    %8 = arith.mulf %0, %7 : vector<128x32xf32>
    %c0_2 = arith.constant 0 : index
    %c0_3 = arith.constant 0 : index
    %9 = vector.load %arg2[%c0_2, %c0_3] : memref<128x32xf32, #tpu.memory_space<vmem>>, vector<128x32xf32>
    tpu.vector_store %arg2[%c0_2, %c0_3], %8 {strides = array<i32>} : memref<128x32xf32, #tpu.memory_space<vmem>>, vector<128x32xf32>,
    return
  }
  func.func @transform_0(%arg0: i32) -> (i32, i32) {
    %c0_i32 = arith.constant 0 : i32
    %c0_i32_0 = arith.constant 0 : i32
    return %arg0, %c0_i32 : i32, i32
  }
  func.func @transform_1(%arg0: i32) -> (i32, i32) {
    %c0_i32 = arith.constant 0 : i32
    %c0_i32_0 = arith.constant 0 : i32
    return %arg0, %c0_i32 : i32, i32
  }
}

</mosaic_0001>

<bundles_post_ra>
// kernel: tpu_custom_call.1
= control target key start
LH: loop header
LB: loop body
LE: loop exit
PB: predicated region body
PF: predicated region fallthrough
CT: control target
= control target key end

     0   :  { %vm40_vm0 = vcmask 261120   ;;  %s407_s0 = inlined_call_operand.vmem [shape: f32[128,32], index: 0, kind: input, shape index: {}]   ;;  %s408_s1 = inlined_call_operand.vmem [shape: f32[128,32], index: 1, kind: output, shape index: {}]  }
   0x1   :  { %v202_v0 = vld [vmem:[%s407_s0 + $0x10] sm:$0xff]  ;;  %v207_v1 = vld [vmem:[%s407_s0] sm:$0xff]  ;;  %v212_v2 = vld [vmem:[%s407_s0 + $0x18] sm:$0xff] }
   0x2   :  { %v26_v3 = vmul.f32 %v202_v0, %v202_v0  ;;  %v24_v4 = vmul.f32 %v207_v1, %v207_v1  ;;  %v27_v5 = vmul.f32 %v212_v2, %v212_v2  ;;  %v223_v6 = vld [vmem:[%s407_s0 + $0x8] sm:$0xff]  ;;  %v235_v9 = vld [vmem:[%s407_s0 + $0x20] sm:$0xff]  ;;  %v248_v16 = vld [vmem:[%s407_s0 + $0x38] sm:$0xff] }
   0x3   :  { %v25_v7 = vmul.f32 %v223_v6, %v223_v6  ;;  %v230_v8 = vld [vmem:[%s407_s0 + $0x28] sm:$0xff]  ;;  %v28_v15 = vmul.f32 %v235_v9, %v235_v9  ;;  %v253_v17 = vld [vmem:[%s407_s0 + $0x30] sm:$0xff]  ;;  %v31_v20 = vmul.f32 %v248_v16, %v248_v16  ;;  %v269_v23 = vld [vmem:[%s407_s0 + $0x40] sm:$0xff] }
   0x4   :  { %v47_v10 = vsel %vm40_vm0, %v26_v3, 0.0  ;;  %v41_v11 = vsel %vm40_vm0, %v24_v4, 0.0  ;;  %v50_v12 = vsel %vm40_vm0, %v27_v5, 0.0  ;;  %v29_v14 = vmul.f32 %v230_v8, %v230_v8  ;;  %v264_v22 = vld [vmem:[%s407_s0 + $0x48] sm:$0xff]  ;;  %v280_v28 = vld [vmem:[%s407_s0 + $0x58] sm:$0xff]  ;;  %v285_v29 = vld [vmem:[%s407_s0 + $0x50] sm:$0xff] }
   0x5   :  { %48 = vadd.xlane.f32.xlu1 %v47_v10  ;;  %42 = vadd.xlane.f32.xlu0 %v41_v11  ;;  %v44_v13 = vsel %vm40_vm0, %v25_v7, 0.0  ;;  %v53_v19 = vsel %vm40_vm0, %v28_v15, 0.0  ;;  %v30_v21 = vmul.f32 %v253_v17, %v253_v17  ;;  %v62_v24 = vsel %vm40_vm0, %v31_v20, 0.0  ;;  %v296_v34 = vld [vmem:[%s407_s0 + $0x68] sm:$0xff]  ;;  %v301_v35 = vld [vmem:[%s407_s0 + $0x60] sm:$0xff]  ;;  %v312_v40 = vld [vmem:[%s407_s0 + $0x78] sm:$0xff] }
   0x6   :  { %v56_v18 = vsel %vm40_vm0, %v29_v14, 0.0  ;;  %v33_v26 = vmul.f32 %v264_v22, %v264_v22  ;;  %v32_v27 = vmul.f32 %v269_v23, %v269_v23  ;;  %v35_v32 = vmul.f32 %v280_v28, %v280_v28  ;;  %v317_v41 = vld [vmem:[%s407_s0 + $0x70] sm:$0xff] }
   0x7   :  { %v59_v25 = vsel %vm40_vm0, %v30_v21, 0.0  ;;  %v34_v33 = vmul.f32 %v285_v29, %v285_v29  ;;  %v37_v38 = vmul.f32 %v296_v34, %v296_v34  ;;  %v36_v39 = vmul.f32 %v301_v35, %v301_v35 }
   0x8   :  { %v68_v30 = vsel %vm40_vm0, %v33_v26, 0.0  ;;  %v65_v31 = vsel %vm40_vm0, %v32_v27, 0.0  ;;  %v74_v36 = vsel %vm40_vm0, %v35_v32, 0.0  ;;  %v39_v44 = vmul.f32 %v312_v40, %v312_v40 }
   0x9   :  { %51 = vadd.xlane.f32.xlu1 %v50_v12  ;;  %45 = vadd.xlane.f32.xlu0 %v44_v13  ;;  %v71_v37 = vsel %vm40_vm0, %v34_v33, 0.0  ;;  %v80_v42 = vsel %vm40_vm0, %v37_v38, 0.0  ;;  %v77_v43 = vsel %vm40_vm0, %v36_v39, 0.0  ;;  %v38_v45 = vmul.f32 %v317_v41, %v317_v41 }
   0xa   :  { %v86_v46 = vsel %vm40_vm0, %v39_v44, 0.0 }
   0xb   :  { %v83_v47 = vsel %vm40_vm0, %v38_v45, 0.0 }
   0xd   :  { %57 = vadd.xlane.f32.xlu1 %v56_v18  ;;  %54 = vadd.xlane.f32.xlu0 %v53_v19 }
  0x11   :  { %63 = vadd.xlane.f32.xlu1 %v62_v24  ;;  %60 = vadd.xlane.f32.xlu0 %v59_v25 }
  0x15   :  { %69 = vadd.xlane.f32.xlu1 %v68_v30  ;;  %66 = vadd.xlane.f32.xlu0 %v65_v31 }
  0x19   :  { %75 = vadd.xlane.f32.xlu1 %v74_v36  ;;  %72 = vadd.xlane.f32.xlu0 %v71_v37 }
  0x1d   :  { %81 = vadd.xlane.f32.xlu1 %v80_v42  ;;  %78 = vadd.xlane.f32.xlu0 %v77_v43 }
  0x21   :  { %87 = vadd.xlane.f32.xlu1 %v86_v46  ;;  %84 = vadd.xlane.f32.xlu0 %v83_v47 }
  0x8e   :  { %v49_v48 = vpop.xlane.xlu1 %48  ;;  %v43_v49 = vpop.xlane.xlu0 %42 }
  0x8f   :  { %v91_v50 = vmax.f32 %v49_v48, 1e-24  ;;  %v89_v51 = vmax.f32 %v43_v49, 1e-24 }
  0x91   :  { %157 = vrsqrt.f32 %v91_v50 }
  0x92   :  { %159 = vrsqrt.f32 %v89_v51  ;;  %v52_v52 = vpop.xlane.xlu1 %51  ;;  %v46_v53 = vpop.xlane.xlu0 %45 }
  0x93   :  { %v92_v54 = vmax.f32 %v52_v52, 1e-24  ;;  %v90_v55 = vmax.f32 %v46_v53, 1e-24 }
  0x95   :  { %161 = vrsqrt.f32 %v92_v54 }
  0x96   :  { %163 = vrsqrt.f32 %v90_v55  ;;  %v58_v56 = vpop.xlane.xlu1 %57  ;;  %v55_v57 = vpop.xlane.xlu0 %54 }
  0x97   :  { %v94_v58 = vmax.f32 %v58_v56, 1e-24  ;;  %v93_v59 = vmax.f32 %v55_v57, 1e-24 }
  0x99   :  { %165 = vrsqrt.f32 %v94_v58 }
  0x9a   :  { %167 = vrsqrt.f32 %v93_v59  ;;  %v64_v60 = vpop.xlane.xlu1 %63  ;;  %v61_v61 = vpop.xlane.xlu0 %60 }
  0x9b   :  { %v96_v62 = vmax.f32 %v64_v60, 1e-24  ;;  %v95_v63 = vmax.f32 %v61_v61, 1e-24 }
  0x9d   :  { %169 = vrsqrt.f32 %v96_v62 }
  0x9e   :  { %v158_v3 = vpop.eup %157  ;;  %171 = vrsqrt.f32 %v95_v63  ;;  %v70_v4 = vpop.xlane.xlu1 %69 }
  0x9f   :  { %v67_v5 = vpop.xlane.xlu0 %66  ;;  %v160_v7 = vpop.eup %159  ;;  %v123_v10 = vmul.f32 %v158_v3, %v202_v0  ;;  %v98_v11 = vmax.f32 %v70_v4, 1e-24 }
  0xa0   :  { %v97_v12 = vmax.f32 %v67_v5, 1e-24  ;;  %v121_v13 = vmul.f32 %v160_v7, %v207_v1 }
  0xa1   :  { %139 = vst.msk [vmem:[%s408_s1 + $0x10] sm:$0xff] %vm40_vm0, %v123_v10  ;;  %173 = vrsqrt.f32 %v98_v11 }
  0xa2   :  { %v162_v14 = vpop.eup %161  ;;  %137 = vst.msk [vmem:[%s408_s1] sm:$0xff] %vm40_vm0, %v121_v13  ;;  %175 = vrsqrt.f32 %v97_v12  ;;  %v76_v15 = vpop.xlane.xlu1 %75 }
  0xa3   :  { %v73_v18 = vpop.xlane.xlu0 %72  ;;  %v164_v0 = vpop.eup %163  ;;  %v124_v19 = vmul.f32 %v162_v14, %v212_v2  ;;  %v100_v20 = vmax.f32 %v76_v15, 1e-24 }
  0xa4   :  { %v99_v1 = vmax.f32 %v73_v18, 1e-24  ;;  %v122_v21 = vmul.f32 %v164_v0, %v223_v6 }
  0xa5   :  { %140 = vst.msk [vmem:[%s408_s1 + $0x18] sm:$0xff] %vm40_vm0, %v124_v19  ;;  %177 = vrsqrt.f32 %v100_v20 }
  0xa6   :  { %v166_v24 = vpop.eup %165  ;;  %138 = vst.msk [vmem:[%s408_s1 + $0x8] sm:$0xff] %vm40_vm0, %v122_v21  ;;  %179 = vrsqrt.f32 %v99_v1  ;;  %v82_v25 = vpop.xlane.xlu1 %81 }
  0xa7   :  { %v79_v26 = vpop.xlane.xlu0 %78  ;;  %v168_v2 = vpop.eup %167  ;;  %v126_v27 = vmul.f32 %v166_v24, %v230_v8  ;;  %v102_v30 = vmax.f32 %v82_v25, 1e-24 }
  0xa8   :  { %v101_v6 = vmax.f32 %v79_v26, 1e-24  ;;  %v125_v31 = vmul.f32 %v168_v2, %v235_v9 }
  0xa9   :  { %142 = vst.msk [vmem:[%s408_s1 + $0x28] sm:$0xff] %vm40_vm0, %v126_v27  ;;  %181 = vrsqrt.f32 %v102_v30 }
  0xaa   :  { %v170_v32 = vpop.eup %169  ;;  %141 = vst.msk [vmem:[%s408_s1 + $0x20] sm:$0xff] %vm40_vm0, %v125_v31  ;;  %183 = vrsqrt.f32 %v101_v6  ;;  %v88_v33 = vpop.xlane.xlu1 %87 }
  0xab   :  { %v85_v36 = vpop.xlane.xlu0 %84  ;;  %v172_v8 = vpop.eup %171  ;;  %v128_v37 = vmul.f32 %v170_v32, %v248_v16  ;;  %v104_v38 = vmax.f32 %v88_v33, 1e-24 }
  0xac   :  { %v103_v9 = vmax.f32 %v85_v36, 1e-24  ;;  %v127_v39 = vmul.f32 %v172_v8, %v253_v17 }
  0xad   :  { %144 = vst.msk [vmem:[%s408_s1 + $0x38] sm:$0xff] %vm40_vm0, %v128_v37  ;;  %185 = vrsqrt.f32 %v104_v38 }
  0xae   :  { %v174_v42 = vpop.eup %173  ;;  %143 = vst.msk [vmem:[%s408_s1 + $0x30] sm:$0xff] %vm40_vm0, %v127_v39  ;;  %187 = vrsqrt.f32 %v103_v9 }
  0xaf   :  { %v176_v43 = vpop.eup %175  ;;  %v130_v16 = vmul.f32 %v174_v42, %v264_v22 }
  0xb0   :  { %v129_v44 = vmul.f32 %v176_v43, %v269_v23 }
  0xb1   :  { %146 = vst.msk [vmem:[%s408_s1 + $0x48] sm:$0xff] %vm40_vm0, %v130_v16 }
  0xb2   :  { %v178_v17 = vpop.eup %177  ;;  %145 = vst.msk [vmem:[%s408_s1 + $0x40] sm:$0xff] %vm40_vm0, %v129_v44 }
  0xb3   :  { %v180_v45 = vpop.eup %179  ;;  %v132_v46 = vmul.f32 %v178_v17, %v280_v28 }
  0xb4   :  { %v131_v47 = vmul.f32 %v180_v45, %v285_v29 }
  0xb5   :  { %148 = vst.msk [vmem:[%s408_s1 + $0x58] sm:$0xff] %vm40_vm0, %v132_v46 }
  0xb6   :  { %v182_v22 = vpop.eup %181  ;;  %147 = vst.msk [vmem:[%s408_s1 + $0x50] sm:$0xff] %vm40_vm0, %v131_v47 }
  0xb7   :  { %v184_v23 = vpop.eup %183  ;;  %v134_v48 = vmul.f32 %v182_v22, %v296_v34 }
  0xb8   :  { %v133_v49 = vmul.f32 %v184_v23, %v301_v35 }
  0xb9   :  { %150 = vst.msk [vmem:[%s408_s1 + $0x68] sm:$0xff] %vm40_vm0, %v134_v48 }
  0xba   :  { %v186_v28 = vpop.eup %185  ;;  %149 = vst.msk [vmem:[%s408_s1 + $0x60] sm:$0xff] %vm40_vm0, %v133_v49 }
  0xbb   :  { %v188_v29 = vpop.eup %187  ;;  %v136_v50 = vmul.f32 %v186_v28, %v312_v40 }
  0xbc   :  { %v135_v51 = vmul.f32 %v188_v29, %v317_v41 }
  0xbd   :  { %152 = vst.msk [vmem:[%s408_s1 + $0x78] sm:$0xff] %vm40_vm0, %v136_v50 }
  0xbe   :  { %151 = vst.msk [vmem:[%s408_s1 + $0x70] sm:$0xff] %vm40_vm0, %v135_v51 }

</bundles_post_ra>
